<compile_context>
chip_gen: v5e
topology: v5e:2x2
jax: 0.10.0
libtpu: 0.0.40
codegen_flags: <defaults>
</compile_context>

<pallas_src>
import functools

import jax
import jax.numpy as jnp
from jax import lax
from jax.experimental import pallas as pl
from jax.experimental.pallas import tpu as pltpu


def _num_tensorcores():
    """Best-effort TensorCores-per-chip (2 on v7x, 1 on v5e/v6e)."""
    try:
        info = pltpu.get_tpu_info()
        for attr in ("num_cores", "core_count", "tensorcore_count",
                     "num_tensorcores", "cores_per_chip"):
            val = getattr(info, attr, None)
            if isinstance(val, int) and 1 <= val <= 8:
                return val
    except Exception:
        pass
    return 1


def _vmem_cap_bytes():
    """Best-effort physical VMEM capacity (64 MiB v7x, 128 MiB v5e/v6e)."""
    try:
        cap = pltpu.get_tpu_info().vmem_capacity_bytes
        if isinstance(cap, int) and cap > 0:
            return cap
    except Exception:
        pass
    return 64 * 1024 * 1024  # conservative (v7x-sized) fallback


def _fz0_kernel(y_ref, v_ref, e_ref, out_ref,
                s_loss, s_abs, s_sq, s_ad,
                *, alpha, epsilon, rows_valid, tile_rows, lanes):
    c = pl.program_id(0)              # outer block ("parallel" -> per-TC on v7x)
    i = pl.program_id(1)              # inner row-tile step ("arbitrary")
    inner = pl.num_programs(1)
    inv_alpha = 1.0 / alpha           # Python float: folds into the constant

    # Fresh full-vreg accumulators at the start of every outer block.
    @pl.when(i == 0)
    def _init():
        s_loss[...] = jnp.zeros_like(s_loss)
        s_abs[...] = jnp.zeros_like(s_abs)
        s_sq[...] = jnp.zeros_like(s_sq)
        s_ad[...] = jnp.zeros_like(s_ad)

    def psum(x):
        # (tile_rows, lanes) -> (8, lanes): elementwise vreg adds only (VPU);
        # the cross-sublane/lane reduce is deferred to the wrapper epilogue.
        return jnp.sum(x.reshape(tile_rows // 8, 8, lanes), axis=0)

    def accumulate(valid):
        y = y_ref[...].astype(jnp.float32)
        v = v_ref[...].astype(jnp.float32)
        e = e_ref[...].astype(jnp.float32)
        if valid is not None:
            # Substitute safe constants BEFORE the math so out-of-bounds
            # garbage can never produce NaN/Inf (NaN * 0 == NaN).
            y = jnp.where(valid, y, 0.0)
            v = jnp.where(valid, v, 0.0)
            e = jnp.where(valid, e, -1.0)
        v = jnp.clip(v, -10.0, 10.0)
        e = jnp.clip(e, -10.0, -epsilon)
        denom = e - epsilon                       # strictly negative after clamp
        inv_denom = 1.0 / denom                   # exact divide keeps 1e-4 rtol
        qterm = jnp.where(y <= v, y * inv_alpha, 0.0)
        # == term1*term2 + term3 + term4 - 1 of the reference, refactored.
        loss = inv_denom * (v - qterm + e) + jnp.log(-denom) - 1.0
        if valid is not None:
            loss = jnp.where(valid, loss, 0.0)    # y=v=0 already zeroes diff
        diff = v - y
        s_loss[...] += psum(loss)
        s_abs[...] += psum(jnp.abs(loss))
        s_sq[...] += psum(diff * diff)
        s_ad[...] += psum(jnp.abs(diff))

    t = c * inner + i                 # global (unclamped) tile index
    row_start = t * tile_rows         # int32 ROW index (not flat elements)
    needs_mask = row_start + tile_rows > rows_valid

    @pl.when(jnp.logical_not(needs_mask))
    def _fast():                      # steady state: no mask work at all
        accumulate(None)

    @pl.when(needs_mask)
    def _tail():                      # only ragged-tail / phantom tiles
        row_ids = lax.broadcasted_iota(jnp.int32, (tile_rows, lanes), 0)
        accumulate(row_start + row_ids < rows_valid)

    # Emit the four (8, 128) partial sums for this outer block once.
    @pl.when(i == inner - 1)
    def _finalize():
        out_ref[0, 0, :, :] = s_loss[...]
        out_ref[0, 1, :, :] = s_abs[...]
        out_ref[0, 2, :, :] = s_sq[...]
        out_ref[0, 3, :, :] = s_ad[...]


def fz0_loss(y_true, var_pred, es_pred, alpha=0.01, epsilon=1e-6,
             tile_rows=2048, lanes=128, num_cores=None):
    # Keep original dtype (e.g. bf16 halves HBM traffic); cast to f32 in-kernel.
    y = jnp.asarray(y_true).reshape(-1)
    v = jnp.asarray(var_pred).reshape(-1)
    e = jnp.asarray(es_pred).reshape(-1)
    n = int(y.shape[0])
    if n == 0:
        raise ValueError("FZ0Loss needs at least one element")

    if num_cores is None:
        num_cores = _num_tensorcores()

    rows_main = n // lanes            # full 128-lane rows handled by the kernel
    rem = n - rows_main * lanes       # sub-128 remainder handled in the wrapper

    sums = jnp.zeros((4,), jnp.float32)

    if rows_main > 0:
        tr = min(int(tile_rows), rows_main)
        tr = max(8, (tr // 8) * 8)
        tiles = pl.cdiv(rows_main, tr)
        n_outer = num_cores if (num_cores > 1 and tiles >= num_cores) else 1
        inner = pl.cdiv(tiles, n_outer)
        last_block = tiles - 1

        nm = rows_main * lanes
        if rem:
            # One slice copy only when n % 128 != 0 (reshape constraint).
            y2 = y[:nm].reshape(rows_main, lanes)
            v2 = v[:nm].reshape(rows_main, lanes)
            e2 = e[:nm].reshape(rows_main, lanes)
        else:
            # Free bitcast view for aligned n.
            y2 = y.reshape(rows_main, lanes)
            v2 = v.reshape(rows_main, lanes)
            e2 = e.reshape(rows_main, lanes)

        kern = functools.partial(
            _fz0_kernel, alpha=float(alpha), epsilon=float(epsilon),
            rows_valid=rows_main, tile_rows=tr, lanes=lanes)

        def in_idx(c, i):
            # Clamp phantom tiles (possible when `tiles` is not divisible by
            # n_outer) onto the last real block; their contribution is zeroed
            # by the in-kernel row mask.
            return (jnp.minimum(c * inner + i, last_block), 0)

        in_spec = pl.BlockSpec((tr, lanes), in_idx)

        # Generation-aware scoped-VMEM bump, only when a big tile needs it
        # (default tr<=2048 in f32 is ~6 MiB double-buffered: under every
        # generation's default scoped limit, so vmem_limit stays None).
        in_bytes = 2 * tr * lanes * (y2.dtype.itemsize + v2.dtype.itemsize
                                     + e2.dtype.itemsize)
        vmem_limit = None
        if in_bytes > (12 << 20):
            cap = max(16 << 20, _vmem_cap_bytes() // 2)   # ~32 MiB v7x, 64 MiB v5e/v6e
            vmem_limit = min(in_bytes + (4 << 20), cap)

        partials = pl.pallas_call(
            kern,
            out_shape=jax.ShapeDtypeStruct((n_outer, 4, 8, lanes), jnp.float32),
            grid_spec=pltpu.PrefetchScalarGridSpec(
                num_scalar_prefetch=0,
                grid=(n_outer, inner),
                in_specs=[in_spec, in_spec, in_spec],
                out_specs=pl.BlockSpec((1, 4, 8, lanes),
                                       lambda c, i: (c, 0, 0, 0)),
                scratch_shapes=[pltpu.VMEM((8, lanes), jnp.float32)
                                for _ in range(4)],
            ),
            compiler_params=pltpu.CompilerParams(
                dimension_semantics=("parallel", "arbitrary"),
                vmem_limit_bytes=vmem_limit),
        )(y2, v2, e2)

        # Tiny epilogue: cross-core / cross-sublane / cross-lane reduce.
        sums = jnp.sum(partials, axis=(0, 2, 3))

    if rem:
        # Sub-128 remainder: a few lines of plain jnp on < 128 elements.
        yt = y[rows_main * lanes:].astype(jnp.float32)
        vt = jnp.clip(v[rows_main * lanes:].astype(jnp.float32), -10.0, 10.0)
        et = jnp.clip(e[rows_main * lanes:].astype(jnp.float32),
                      -10.0, -float(epsilon))
        denom = et - float(epsilon)
        qterm = jnp.where(yt <= vt, yt * (1.0 / float(alpha)), 0.0)
        loss_t = (vt - qterm + et) / denom + jnp.log(-denom) - 1.0
        diff_t = vt - yt
        sums = sums + jnp.stack([jnp.sum(loss_t), jnp.sum(jnp.abs(loss_t)),
                                 jnp.sum(diff_t * diff_t),
                                 jnp.sum(jnp.abs(diff_t))])

    inv_n = 1.0 / float(n)
    # mean(loss / mean|loss|) == sum(loss) / sum(|loss|)
    return sums[0] / sums[1] + 0.5 * sums[2] * inv_n + 0.1 * sums[3] * inv_n


def fz0_loss_ref(y_true, var_pred, es_pred, alpha=0.01, epsilon=1e-6):
    # Pure-JAX reference mirroring the PyTorch forward exactly.
    y = jnp.asarray(y_true, jnp.float32).reshape(-1)
    v = jnp.clip(jnp.asarray(var_pred, jnp.float32).reshape(-1), -10.0, 10.0)
    e = jnp.clip(jnp.asarray(es_pred, jnp.float32).reshape(-1), -10.0, -epsilon)
    indicator = (y <= v).astype(jnp.float32)
    term1 = -1.0 / (e - epsilon)
    term2 = (1.0 / alpha) * (y * indicator) - e
    term3 = v / (e - epsilon)
    term4 = jnp.log(-(e - epsilon))
    loss = term1 * term2 + term3 + term4 - 1.0
    loss = loss / jnp.abs(loss).mean()
    dev_pen = 0.5 * jnp.mean((v - y) ** 2)
    conf_pen = 0.1 * jnp.mean(jnp.abs(v - y))
    return loss.mean() + dev_pen + conf_pen


if __name__ == "__main__":
    # FZ0Loss has no learnable parameters; only alpha / epsilon hyperparams.
    key = jax.random.PRNGKey(0)
    k1, k2, k3, k4, k5, k6 = jax.random.split(key, 6)

    # Case 1: small synthetic "returns" tensor, n = 2048 (128-aligned).
    shape = (2, 4, 16, 16)
    y_true = 0.05 * jax.random.normal(k1, shape, dtype=jnp.float32)
    var_pred = -0.1 + 0.05 * jax.random.normal(k2, shape, dtype=jnp.float32)
    es_pred = -0.2 + 0.05 * jax.random.normal(k3, shape, dtype=jnp.float32)

    out = jax.block_until_ready(fz0_loss(y_true, var_pred, es_pred))
    ref = jax.block_until_ready(fz0_loss_ref(y_true, var_pred, es_pred))
    assert jnp.isfinite(out), "kernel produced non-finite loss"
    assert jnp.allclose(out, ref, rtol=1e-4, atol=1e-5), (out, ref)

    # Case 2: ragged n = 2500 (exercises in-kernel row mask + wrapper tail).
    n2 = 2500
    y2 = 0.05 * jax.random.normal(k4, (n2,), dtype=jnp.float32)
    v2 = -0.1 + 0.05 * jax.random.normal(k5, (n2,), dtype=jnp.float32)
    e2 = -0.2 + 0.05 * jax.random.normal(k6, (n2,), dtype=jnp.float32)

    out2 = jax.block_until_ready(fz0_loss(y2, v2, e2))
    ref2 = jax.block_until_ready(fz0_loss_ref(y2, v2, e2))
    assert jnp.isfinite(out2), "kernel produced non-finite loss (ragged)"
    assert jnp.allclose(out2, ref2, rtol=1e-4, atol=1e-5), (out2, ref2)

    print("KERNEL_OK")
</pallas_src>

<mosaic_0001>
module attributes {stable_mosaic.version = 11 : i64} {
  func.func @_fz0_kernel(%arg0: i32, %arg1: i32, %arg2: memref<16x128xf32, #tpu.memory_space<vmem>>, %arg3: memref<16x128xf32, #tpu.memory_space<vmem>>, %arg4: memref<16x128xf32, #tpu.memory_space<vmem>>, %arg5: memref<1x4x8x128xf32, #tpu.memory_space<vmem>>, %arg6: memref<8x128xf32, #tpu.memory_space<vmem>>, %arg7: memref<8x128xf32, #tpu.memory_space<vmem>>, %arg8: memref<8x128xf32, #tpu.memory_space<vmem>>, %arg9: memref<8x128xf32, #tpu.memory_space<vmem>>) attributes {dimension_semantics = [#tpu.dimension_semantics<parallel>, #tpu.dimension_semantics<arbitrary>], iteration_bounds = array<i64: 1, 1>, scalar_prefetch = 0 : i64, scratch_operands = 4 : i64, tpu.core_type = #tpu.core_type<tc>, window_params = [{transform_indices = @transform_0, window_bounds = array<i64: 16, 128>}, {transform_indices = @transform_1, window_bounds = array<i64: 16, 128>}, {transform_indices = @transform_2, window_bounds = array<i64: 16, 128>}, {transform_indices = @transform_3, window_bounds = array<i64: 1, 4, 8, 128>}]} {
    %c0_i32 = arith.constant 0 : i32
    %0 = arith.cmpi eq, %arg1, %c0_i32 : i32
    %1 = arith.extui %0 : i1 to i32
    %c0_i32_0 = arith.constant 0 : i32
    %2 = arith.cmpi ne, %1, %c0_i32_0 : i32
    scf.if %2 {
      %cst = arith.constant 0.000000e+00 : f32
      %16 = vector.broadcast %cst : f32 to vector<8x128xf32>
      %c0 = arith.constant 0 : index
      %c0_7 = arith.constant 0 : index
      %17 = vector.load %arg6[%c0, %c0_7] : memref<8x128xf32, #tpu.memory_space<vmem>>, vector<8x128xf32>
      tpu.vector_store %arg6[%c0, %c0_7], %16 {strides = array<i32>} : memref<8x128xf32, #tpu.memory_space<vmem>>, vector<8x128xf32>,
      %cst_8 = arith.constant 0.000000e+00 : f32
      %18 = vector.broadcast %cst_8 : f32 to vector<8x128xf32>
      %c0_9 = arith.constant 0 : index
      %c0_10 = arith.constant 0 : index
      %19 = vector.load %arg7[%c0_9, %c0_10] : memref<8x128xf32, #tpu.memory_space<vmem>>, vector<8x128xf32>
      tpu.vector_store %arg7[%c0_9, %c0_10], %18 {strides = array<i32>} : memref<8x128xf32, #tpu.memory_space<vmem>>, vector<8x128xf32>,
      %cst_11 = arith.constant 0.000000e+00 : f32
      %20 = vector.broadcast %cst_11 : f32 to vector<8x128xf32>
      %c0_12 = arith.constant 0 : index
      %c0_13 = arith.constant 0 : index
      %21 = vector.load %arg8[%c0_12, %c0_13] : memref<8x128xf32, #tpu.memory_space<vmem>>, vector<8x128xf32>
      tpu.vector_store %arg8[%c0_12, %c0_13], %20 {strides = array<i32>} : memref<8x128xf32, #tpu.memory_space<vmem>>, vector<8x128xf32>,
      %cst_14 = arith.constant 0.000000e+00 : f32
      %22 = vector.broadcast %cst_14 : f32 to vector<8x128xf32>
      %c0_15 = arith.constant 0 : index
      %c0_16 = arith.constant 0 : index
      %23 = vector.load %arg9[%c0_15, %c0_16] : memref<8x128xf32, #tpu.memory_space<vmem>>, vector<8x128xf32>
      tpu.vector_store %arg9[%c0_15, %c0_16], %22 {strides = array<i32>} : memref<8x128xf32, #tpu.memory_space<vmem>>, vector<8x128xf32>,
    } else {
    }
    %c1_i32 = arith.constant 1 : i32
    %3 = arith.muli %arg0, %c1_i32 : i32
    %4 = arith.addi %3, %arg1 : i32
    %c16_i32 = arith.constant 16 : i32
    %5 = arith.muli %4, %c16_i32 : i32
    %c16_i32_1 = arith.constant 16 : i32
    %6 = arith.addi %5, %c16_i32_1 : i32
    %c16_i32_2 = arith.constant 16 : i32
    %7 = arith.cmpi sgt, %6, %c16_i32_2 : i32
    %true = arith.constant true
    %8 = arith.xori %7, %true : i1
    %9 = arith.extui %8 : i1 to i32
    %c0_i32_3 = arith.constant 0 : i32
    %10 = arith.cmpi ne, %9, %c0_i32_3 : i32
    scf.if %10 {
      %c0 = arith.constant 0 : index
      %c0_7 = arith.constant 0 : index
      %16 = vector.load %arg2[%c0, %c0_7] : memref<16x128xf32, #tpu.memory_space<vmem>>, vector<16x128xf32>
      %c0_8 = arith.constant 0 : index
      %c0_9 = arith.constant 0 : index
      %17 = vector.load %arg3[%c0_8, %c0_9] : memref<16x128xf32, #tpu.memory_space<vmem>>, vector<16x128xf32>
      %c0_10 = arith.constant 0 : index
      %c0_11 = arith.constant 0 : index
      %18 = vector.load %arg4[%c0_10, %c0_11] : memref<16x128xf32, #tpu.memory_space<vmem>>, vector<16x128xf32>
      %cst = arith.constant -1.000000e+01 : f32
      %cst_12 = arith.constant 1.000000e+01 : f32
      %19 = vector.broadcast %cst : f32 to vector<16x128xf32>
      %20 = arith.maximumf %19, %17 : vector<16x128xf32>
      %21 = vector.broadcast %cst_12 : f32 to vector<16x128xf32>
      %22 = arith.minimumf %21, %20 : vector<16x128xf32>
      %cst_13 = arith.constant -1.000000e+01 : f32
      %cst_14 = arith.constant -9.99999997E-7 : f32
      %23 = vector.broadcast %cst_13 : f32 to vector<16x128xf32>
      %24 = arith.maximumf %23, %18 : vector<16x128xf32>
      %25 = vector.broadcast %cst_14 : f32 to vector<16x128xf32>
      %26 = arith.minimumf %25, %24 : vector<16x128xf32>
      %cst_15 = arith.constant 9.99999997E-7 : f32
      %27 = vector.broadcast %cst_15 : f32 to vector<16x128xf32>
      %28 = arith.subf %26, %27 : vector<16x128xf32>
      %cst_16 = arith.constant 1.000000e+00 : f32
      %29 = vector.broadcast %cst_16 : f32 to vector<16x128xf32>
      %30 = arith.divf %29, %28 : vector<16x128xf32>
      %31 = arith.cmpf ole, %16, %22 : vector<16x128xf32>
      %cst_17 = arith.constant 1.000000e+02 : f32
      %32 = vector.broadcast %cst_17 : f32 to vector<16x128xf32>
      %33 = arith.mulf %16, %32 : vector<16x128xf32>
      %cst_18 = arith.constant 0.000000e+00 : f32
      %34 = vector.broadcast %cst_18 : f32 to vector<16x128xf32>
      %35 = arith.select %31, %33, %34 : vector<16x128xi1>, vector<16x128xf32>
      %36 = arith.subf %22, %35 : vector<16x128xf32>
      %37 = arith.addf %36, %26 : vector<16x128xf32>
      %38 = arith.mulf %30, %37 : vector<16x128xf32>
      %cst_19 = arith.constant 0.000000e+00 : f32
      %39 = vector.broadcast %cst_19 : f32 to vector<16x128xf32>
      %40 = arith.subf %39, %28 : vector<16x128xf32>
      %41 = math.log %40 : vector<16x128xf32>
      %42 = arith.addf %38, %41 : vector<16x128xf32>
      %cst_20 = arith.constant 1.000000e+00 : f32
      %43 = vector.broadcast %cst_20 : f32 to vector<16x128xf32>
      %44 = arith.subf %42, %43 : vector<16x128xf32>
      %45 = arith.subf %22, %16 : vector<16x128xf32>
      %c0_21 = arith.constant 0 : index
      %c0_22 = arith.constant 0 : index
      %46 = vector.load %arg6[%c0_21, %c0_22] : memref<8x128xf32, #tpu.memory_space<vmem>>, vector<8x128xf32>
      %47 = vector.shape_cast %44 : vector<16x128xf32> to vector<2x8x128xf32>
      %cst_23 = arith.constant dense<0.000000e+00> : vector<8x128xf32>
      %48 = vector.multi_reduction <add>, %47, %cst_23 [0] : vector<2x8x128xf32> to vector<8x128xf32>
      %49 = arith.addf %46, %48 : vector<8x128xf32>
      %c0_24 = arith.constant 0 : index
      %c0_25 = arith.constant 0 : index
      %50 = vector.load %arg6[%c0_24, %c0_25] : memref<8x128xf32, #tpu.memory_space<vmem>>, vector<8x128xf32>
      tpu.vector_store %arg6[%c0_24, %c0_25], %49 {strides = array<i32>} : memref<8x128xf32, #tpu.memory_space<vmem>>, vector<8x128xf32>,
      %c0_26 = arith.constant 0 : index
      %c0_27 = arith.constant 0 : index
      %51 = vector.load %arg7[%c0_26, %c0_27] : memref<8x128xf32, #tpu.memory_space<vmem>>, vector<8x128xf32>
      %52 = math.absf %44 : vector<16x128xf32>
      %53 = vector.shape_cast %52 : vector<16x128xf32> to vector<2x8x128xf32>
      %cst_28 = arith.constant dense<0.000000e+00> : vector<8x128xf32>
      %54 = vector.multi_reduction <add>, %53, %cst_28 [0] : vector<2x8x128xf32> to vector<8x128xf32>
      %55 = arith.addf %51, %54 : vector<8x128xf32>
      %c0_29 = arith.constant 0 : index
      %c0_30 = arith.constant 0 : index
      %56 = vector.load %arg7[%c0_29, %c0_30] : memref<8x128xf32, #tpu.memory_space<vmem>>, vector<8x128xf32>
      tpu.vector_store %arg7[%c0_29, %c0_30], %55 {strides = array<i32>} : memref<8x128xf32, #tpu.memory_space<vmem>>, vector<8x128xf32>,
      %c0_31 = arith.constant 0 : index
      %c0_32 = arith.constant 0 : index
      %57 = vector.load %arg8[%c0_31, %c0_32] : memref<8x128xf32, #tpu.memory_space<vmem>>, vector<8x128xf32>
      %58 = arith.mulf %45, %45 : vector<16x128xf32>
      %59 = vector.shape_cast %58 : vector<16x128xf32> to vector<2x8x128xf32>
      %cst_33 = arith.constant dense<0.000000e+00> : vector<8x128xf32>
      %60 = vector.multi_reduction <add>, %59, %cst_33 [0] : vector<2x8x128xf32> to vector<8x128xf32>
      %61 = arith.addf %57, %60 : vector<8x128xf32>
      %c0_34 = arith.constant 0 : index
      %c0_35 = arith.constant 0 : index
      %62 = vector.load %arg8[%c0_34, %c0_35] : memref<8x128xf32, #tpu.memory_space<vmem>>, vector<8x128xf32>
      tpu.vector_store %arg8[%c0_34, %c0_35], %61 {strides = array<i32>} : memref<8x128xf32, #tpu.memory_space<vmem>>, vector<8x128xf32>,
      %c0_36 = arith.constant 0 : index
      %c0_37 = arith.constant 0 : index
      %63 = vector.load %arg9[%c0_36, %c0_37] : memref<8x128xf32, #tpu.memory_space<vmem>>, vector<8x128xf32>
      %64 = math.absf %45 : vector<16x128xf32>
      %65 = vector.shape_cast %64 : vector<16x128xf32> to vector<2x8x128xf32>
      %cst_38 = arith.constant dense<0.000000e+00> : vector<8x128xf32>
      %66 = vector.multi_reduction <add>, %65, %cst_38 [0] : vector<2x8x128xf32> to vector<8x128xf32>
      %67 = arith.addf %63, %66 : vector<8x128xf32>
      %c0_39 = arith.constant 0 : index
      %c0_40 = arith.constant 0 : index
      %68 = vector.load %arg9[%c0_39, %c0_40] : memref<8x128xf32, #tpu.memory_space<vmem>>, vector<8x128xf32>
      tpu.vector_store %arg9[%c0_39, %c0_40], %67 {strides = array<i32>} : memref<8x128xf32, #tpu.memory_space<vmem>>, vector<8x128xf32>,
    } else {
    }
    %11 = arith.extui %7 : i1 to i32
    %c0_i32_4 = arith.constant 0 : i32
    %12 = arith.cmpi ne, %11, %c0_i32_4 : i32
    scf.if %12 {
      %16 = tpu.iota {dimensions = array<i32: 0>} : vector<16x128xi32>
      %17 = vector.broadcast %5 : i32 to vector<16x128xi32>
      %18 = arith.addi %17, %16 : vector<16x128xi32>
      %c16_i32_7 = arith.constant 16 : i32
      %19 = vector.broadcast %c16_i32_7 : i32 to vector<16x128xi32>
      %20 = arith.cmpi slt, %18, %19 : vector<16x128xi32>
      %c0 = arith.constant 0 : index
      %c0_8 = arith.constant 0 : index
      %21 = vector.load %arg2[%c0, %c0_8] : memref<16x128xf32, #tpu.memory_space<vmem>>, vector<16x128xf32>
      %c0_9 = arith.constant 0 : index
      %c0_10 = arith.constant 0 : index
      %22 = vector.load %arg3[%c0_9, %c0_10] : memref<16x128xf32, #tpu.memory_space<vmem>>, vector<16x128xf32>
      %c0_11 = arith.constant 0 : index
      %c0_12 = arith.constant 0 : index
      %23 = vector.load %arg4[%c0_11, %c0_12] : memref<16x128xf32, #tpu.memory_space<vmem>>, vector<16x128xf32>
      %cst = arith.constant 0.000000e+00 : f32
      %24 = vector.broadcast %cst : f32 to vector<16x128xf32>
      %25 = arith.select %20, %21, %24 : vector<16x128xi1>, vector<16x128xf32>
      %cst_13 = arith.constant 0.000000e+00 : f32
      %26 = vector.broadcast %cst_13 : f32 to vector<16x128xf32>
      %27 = arith.select %20, %22, %26 : vector<16x128xi1>, vector<16x128xf32>
      %cst_14 = arith.constant -1.000000e+00 : f32
      %28 = vector.broadcast %cst_14 : f32 to vector<16x128xf32>
      %29 = arith.select %20, %23, %28 : vector<16x128xi1>, vector<16x128xf32>
      %cst_15 = arith.constant -1.000000e+01 : f32
      %cst_16 = arith.constant 1.000000e+01 : f32
      %30 = vector.broadcast %cst_15 : f32 to vector<16x128xf32>
      %31 = arith.maximumf %30, %27 : vector<16x128xf32>
      %32 = vector.broadcast %cst_16 : f32 to vector<16x128xf32>
      %33 = arith.minimumf %32, %31 : vector<16x128xf32>
      %cst_17 = arith.constant -1.000000e+01 : f32
      %cst_18 = arith.constant -9.99999997E-7 : f32
      %34 = vector.broadcast %cst_17 : f32 to vector<16x128xf32>
      %35 = arith.maximumf %34, %29 : vector<16x128xf32>
      %36 = vector.broadcast %cst_18 : f32 to vector<16x128xf32>
      %37 = arith.minimumf %36, %35 : vector<16x128xf32>
      %cst_19 = arith.constant 9.99999997E-7 : f32
      %38 = vector.broadcast %cst_19 : f32 to vector<16x128xf32>
      %39 = arith.subf %37, %38 : vector<16x128xf32>
      %cst_20 = arith.constant 1.000000e+00 : f32
      %40 = vector.broadcast %cst_20 : f32 to vector<16x128xf32>
      %41 = arith.divf %40, %39 : vector<16x128xf32>
      %42 = arith.cmpf ole, %25, %33 : vector<16x128xf32>
      %cst_21 = arith.constant 1.000000e+02 : f32
      %43 = vector.broadcast %cst_21 : f32 to vector<16x128xf32>
      %44 = arith.mulf %25, %43 : vector<16x128xf32>
      %cst_22 = arith.constant 0.000000e+00 : f32
      %45 = vector.broadcast %cst_22 : f32 to vector<16x128xf32>
      %46 = arith.select %42, %44, %45 : vector<16x128xi1>, vector<16x128xf32>
      %47 = arith.subf %33, %46 : vector<16x128xf32>
      %48 = arith.addf %47, %37 : vector<16x128xf32>
      %49 = arith.mulf %41, %48 : vector<16x128xf32>
      %cst_23 = arith.constant 0.000000e+00 : f32
      %50 = vector.broadcast %cst_23 : f32 to vector<16x128xf32>
      %51 = arith.subf %50, %39 : vector<16x128xf32>
      %52 = math.log %51 : vector<16x128xf32>
      %53 = arith.addf %49, %52 : vector<16x128xf32>
      %cst_24 = arith.constant 1.000000e+00 : f32
      %54 = vector.broadcast %cst_24 : f32 to vector<16x128xf32>
      %55 = arith.subf %53, %54 : vector<16x128xf32>
      %cst_25 = arith.constant 0.000000e+00 : f32
      %56 = vector.broadcast %cst_25 : f32 to vector<16x128xf32>
      %57 = arith.select %20, %55, %56 : vector<16x128xi1>, vector<16x128xf32>
      %58 = arith.subf %33, %25 : vector<16x128xf32>
      %c0_26 = arith.constant 0 : index
      %c0_27 = arith.constant 0 : index
      %59 = vector.load %arg6[%c0_26, %c0_27] : memref<8x128xf32, #tpu.memory_space<vmem>>, vector<8x128xf32>
      %60 = vector.shape_cast %57 : vector<16x128xf32> to vector<2x8x128xf32>
      %cst_28 = arith.constant dense<0.000000e+00> : vector<8x128xf32>
      %61 = vector.multi_reduction <add>, %60, %cst_28 [0] : vector<2x8x128xf32> to vector<8x128xf32>
      %62 = arith.addf %59, %61 : vector<8x128xf32>
      %c0_29 = arith.constant 0 : index
      %c0_30 = arith.constant 0 : index
      %63 = vector.load %arg6[%c0_29, %c0_30] : memref<8x128xf32, #tpu.memory_space<vmem>>, vector<8x128xf32>
      tpu.vector_store %arg6[%c0_29, %c0_30], %62 {strides = array<i32>} : memref<8x128xf32, #tpu.memory_space<vmem>>, vector<8x128xf32>,
      %c0_31 = arith.constant 0 : index
      %c0_32 = arith.constant 0 : index
      %64 = vector.load %arg7[%c0_31, %c0_32] : memref<8x128xf32, #tpu.memory_space<vmem>>, vector<8x128xf32>
      %65 = math.absf %57 : vector<16x128xf32>
      %66 = vector.shape_cast %65 : vector<16x128xf32> to vector<2x8x128xf32>
      %cst_33 = arith.constant dense<0.000000e+00> : vector<8x128xf32>
      %67 = vector.multi_reduction <add>, %66, %cst_33 [0] : vector<2x8x128xf32> to vector<8x128xf32>
      %68 = arith.addf %64, %67 : vector<8x128xf32>
      %c0_34 = arith.constant 0 : index
      %c0_35 = arith.constant 0 : index
      %69 = vector.load %arg7[%c0_34, %c0_35] : memref<8x128xf32, #tpu.memory_space<vmem>>, vector<8x128xf32>
      tpu.vector_store %arg7[%c0_34, %c0_35], %68 {strides = array<i32>} : memref<8x128xf32, #tpu.memory_space<vmem>>, vector<8x128xf32>,
      %c0_36 = arith.constant 0 : index
      %c0_37 = arith.constant 0 : index
      %70 = vector.load %arg8[%c0_36, %c0_37] : memref<8x128xf32, #tpu.memory_space<vmem>>, vector<8x128xf32>
      %71 = arith.mulf %58, %58 : vector<16x128xf32>
      %72 = vector.shape_cast %71 : vector<16x128xf32> to vector<2x8x128xf32>
      %cst_38 = arith.constant dense<0.000000e+00> : vector<8x128xf32>
      %73 = vector.multi_reduction <add>, %72, %cst_38 [0] : vector<2x8x128xf32> to vector<8x128xf32>
      %74 = arith.addf %70, %73 : vector<8x128xf32>
      %c0_39 = arith.constant 0 : index
      %c0_40 = arith.constant 0 : index
      %75 = vector.load %arg8[%c0_39, %c0_40] : memref<8x128xf32, #tpu.memory_space<vmem>>, vector<8x128xf32>
      tpu.vector_store %arg8[%c0_39, %c0_40], %74 {strides = array<i32>} : memref<8x128xf32, #tpu.memory_space<vmem>>, vector<8x128xf32>,
      %c0_41 = arith.constant 0 : index
      %c0_42 = arith.constant 0 : index
      %76 = vector.load %arg9[%c0_41, %c0_42] : memref<8x128xf32, #tpu.memory_space<vmem>>, vector<8x128xf32>
      %77 = math.absf %58 : vector<16x128xf32>
      %78 = vector.shape_cast %77 : vector<16x128xf32> to vector<2x8x128xf32>
      %cst_43 = arith.constant dense<0.000000e+00> : vector<8x128xf32>
      %79 = vector.multi_reduction <add>, %78, %cst_43 [0] : vector<2x8x128xf32> to vector<8x128xf32>
      %80 = arith.addf %76, %79 : vector<8x128xf32>
      %c0_44 = arith.constant 0 : index
      %c0_45 = arith.constant 0 : index
      %81 = vector.load %arg9[%c0_44, %c0_45] : memref<8x128xf32, #tpu.memory_space<vmem>>, vector<8x128xf32>
      tpu.vector_store %arg9[%c0_44, %c0_45], %80 {strides = array<i32>} : memref<8x128xf32, #tpu.memory_space<vmem>>, vector<8x128xf32>,
    } else {
    }
    %c0_i32_5 = arith.constant 0 : i32
    %13 = arith.cmpi eq, %arg1, %c0_i32_5 : i32
    %14 = arith.extui %13 : i1 to i32
    %c0_i32_6 = arith.constant 0 : i32
    %15 = arith.cmpi ne, %14, %c0_i32_6 : i32
    scf.if %15 {
      %c0 = arith.constant 0 : index
      %c0_7 = arith.constant 0 : index
      %16 = vector.load %arg6[%c0, %c0_7] : memref<8x128xf32, #tpu.memory_space<vmem>>, vector<8x128xf32>
      %c0_8 = arith.constant 0 : index
      %c0_9 = arith.constant 0 : index
      %c0_10 = arith.constant 0 : index
      %c0_11 = arith.constant 0 : index
      %17 = vector.load %arg5[%c0_8, %c0_9, %c0_10, %c0_11] : memref<1x4x8x128xf32, #tpu.memory_space<vmem>>, vector<1x1x8x128xf32>
      %18 = vector.shape_cast %17 : vector<1x1x8x128xf32> to vector<8x128xf32>
      %19 = vector.shape_cast %16 : vector<8x128xf32> to vector<1x1x8x128xf32>
      tpu.vector_store %arg5[%c0_8, %c0_9, %c0_10, %c0_11], %19 {strides = array<i32>} : memref<1x4x8x128xf32, #tpu.memory_space<vmem>>, vector<1x1x8x128xf32>,
      %c0_12 = arith.constant 0 : index
      %c0_13 = arith.constant 0 : index
      %20 = vector.load %arg7[%c0_12, %c0_13] : memref<8x128xf32, #tpu.memory_space<vmem>>, vector<8x128xf32>
      %c0_14 = arith.constant 0 : index
      %c1 = arith.constant 1 : index
      %c0_15 = arith.constant 0 : index
      %c0_16 = arith.constant 0 : index
      %21 = vector.load %arg5[%c0_14, %c1, %c0_15, %c0_16] : memref<1x4x8x128xf32, #tpu.memory_space<vmem>>, vector<1x1x8x128xf32>
      %22 = vector.shape_cast %21 : vector<1x1x8x128xf32> to vector<8x128xf32>
      %23 = vector.shape_cast %20 : vector<8x128xf32> to vector<1x1x8x128xf32>
      tpu.vector_store %arg5[%c0_14, %c1, %c0_15, %c0_16], %23 {strides = array<i32>} : memref<1x4x8x128xf32, #tpu.memory_space<vmem>>, vector<1x1x8x128xf32>,
      %c0_17 = arith.constant 0 : index
      %c0_18 = arith.constant 0 : index
      %24 = vector.load %arg8[%c0_17, %c0_18] : memref<8x128xf32, #tpu.memory_space<vmem>>, vector<8x128xf32>
      %c0_19 = arith.constant 0 : index
      %c2 = arith.constant 2 : index
      %c0_20 = arith.constant 0 : index
      %c0_21 = arith.constant 0 : index
      %25 = vector.load %arg5[%c0_19, %c2, %c0_20, %c0_21] : memref<1x4x8x128xf32, #tpu.memory_space<vmem>>, vector<1x1x8x128xf32>
      %26 = vector.shape_cast %25 : vector<1x1x8x128xf32> to vector<8x128xf32>
      %27 = vector.shape_cast %24 : vector<8x128xf32> to vector<1x1x8x128xf32>
      tpu.vector_store %arg5[%c0_19, %c2, %c0_20, %c0_21], %27 {strides = array<i32>} : memref<1x4x8x128xf32, #tpu.memory_space<vmem>>, vector<1x1x8x128xf32>,
      %c0_22 = arith.constant 0 : index
      %c0_23 = arith.constant 0 : index
      %28 = vector.load %arg9[%c0_22, %c0_23] : memref<8x128xf32, #tpu.memory_space<vmem>>, vector<8x128xf32>
      %c0_24 = arith.constant 0 : index
      %c3 = arith.constant 3 : index
      %c0_25 = arith.constant 0 : index
      %c0_26 = arith.constant 0 : index
      %29 = vector.load %arg5[%c0_24, %c3, %c0_25, %c0_26] : memref<1x4x8x128xf32, #tpu.memory_space<vmem>>, vector<1x1x8x128xf32>
      %30 = vector.shape_cast %29 : vector<1x1x8x128xf32> to vector<8x128xf32>
      %31 = vector.shape_cast %28 : vector<8x128xf32> to vector<1x1x8x128xf32>
      tpu.vector_store %arg5[%c0_24, %c3, %c0_25, %c0_26], %31 {strides = array<i32>} : memref<1x4x8x128xf32, #tpu.memory_space<vmem>>, vector<1x1x8x128xf32>,
    } else {
    }
    return
  }
  func.func @transform_0(%arg0: i32, %arg1: i32) -> (i32, i32) {
    %c1_i32 = arith.constant 1 : i32
    %0 = arith.muli %arg0, %c1_i32 : i32
    %1 = arith.addi %0, %arg1 : i32
    %c0_i32 = arith.constant 0 : i32
    %2 = arith.minsi %1, %c0_i32 : i32
    %c0_i32_0 = arith.constant 0 : i32
    %c0_i32_1 = arith.constant 0 : i32
    return %2, %c0_i32_0 : i32, i32
  }
  func.func @transform_1(%arg0: i32, %arg1: i32) -> (i32, i32) {
    %c1_i32 = arith.constant 1 : i32
    %0 = arith.muli %arg0, %c1_i32 : i32
    %1 = arith.addi %0, %arg1 : i32
    %c0_i32 = arith.constant 0 : i32
    %2 = arith.minsi %1, %c0_i32 : i32
    %c0_i32_0 = arith.constant 0 : i32
    %c0_i32_1 = arith.constant 0 : i32
    return %2, %c0_i32_0 : i32, i32
  }
  func.func @transform_2(%arg0: i32, %arg1: i32) -> (i32, i32) {
    %c1_i32 = arith.constant 1 : i32
    %0 = arith.muli %arg0, %c1_i32 : i32
    %1 = arith.addi %0, %arg1 : i32
    %c0_i32 = arith.constant 0 : i32
    %2 = arith.minsi %1, %c0_i32 : i32
    %c0_i32_0 = arith.constant 0 : i32
    %c0_i32_1 = arith.constant 0 : i32
    return %2, %c0_i32_0 : i32, i32
  }
  func.func @transform_3(%arg0: i32, %arg1: i32) -> (i32, i32, i32, i32) {
    %c0_i32 = arith.constant 0 : i32
    %c0_i32_0 = arith.constant 0 : i32
    %c0_i32_1 = arith.constant 0 : i32
    %c0_i32_2 = arith.constant 0 : i32
    return %arg0, %c0_i32, %c0_i32_0, %c0_i32_1 : i32, i32, i32, i32
  }
}

</mosaic_0001>

<bundles_post_ra>
// kernel: tpu_custom_call.1
= control target key start
LH: loop header
LB: loop body
LE: loop exit
PB: predicated region body
PF: predicated region fallthrough
CT: control target
= control target key end

     0   :  { %8 = vsyncpa [#allocation7], 0  ;;  %s529_s0 = inlined_call_operand.hbm [shape: f32[16,128], index: 0, kind: input, shape index: {}]   ;;  %s530_s1 = inlined_call_operand.hbm [shape: f32[16,128], index: 1, kind: input, shape index: {}]   ;;  %s531_s2 = inlined_call_operand.hbm [shape: f32[16,128], index: 2, kind: input, shape index: {}]   ;;  %s532_s3 = inlined_call_operand.hbm [shape: f32[1,4,8,128], index: 3, kind: output, shape index: {}]  }
   0x1   :  { %9 = vsyncpa [#allocation10], 0 }
   0x2   :  { %10 = vsyncpa [#allocation8], 0  ;;  %s40_s14 = sshll.u32 %s530_s1, 4  ;;  %s479_s15 = smov [#allocation9]   ;;  %s41_s14 = int_to_ptr.hbm [resolvable:$true] %s40_s14 }
   0x3   :  { %s42_s16 = sshll.u32 %s479_s15, 4  ;;  %s21_s19 = sshll.u32 %s529_s0, 4  ;;  %s43_s16 = int_to_ptr.vmem [resolvable:$true] %s42_s16  ;;  %s22_s19 = int_to_ptr.hbm [resolvable:$true] %s21_s19 }
   0x4   :  { %s480_s20 = smov 128   ;;  %s481_s21 = smov 8  }
   0x5   :  { %48 = dma.hbm_to_vmem [thread:$0]  %s41_s14, 256, %s43_s16, [#allocation10], %s480_s20, %s480_s20, %s481_s21  }
   0x6   :  { %s482_s22 = smov [#allocation6]   ;;  %s59_s1 = sshll.u32 %s531_s2, 4  ;;  %s60_s1 = int_to_ptr.hbm [resolvable:$true] %s59_s1 }
   0x7   :  { %s23_s23 = sshll.u32 %s482_s22, 4  ;;  %s483_s0 = smov [#allocation11]   ;;  %s24_s23 = int_to_ptr.vmem [resolvable:$true] %s23_s23 }
   0x8   :  { %29 = dma.hbm_to_vmem [thread:$0]  %s22_s19, 256, %s24_s23, [#allocation7], %s480_s20, %s480_s20, %s481_s21  }
   0x9   :  { %s61_s26 = sshll.u32 %s483_s0, 4  ;;  %s62_s26 = int_to_ptr.vmem [resolvable:$true] %s61_s26 }
   0xa   :  { %67 = dma.hbm_to_vmem [thread:$0]  %s60_s1, 256, %s62_s26, [#allocation10], %s480_s20, %s480_s20, %s481_s21  }
   0xb   :  { %473 = dma.done.wait [#allocation7], 256  }
   0xc   :  { %474 = vsyncadd [#allocation7], 4294967040 }
   0xd   :  { %475 = dma.done.wait [#allocation10], 512  }
   0xe   :  { %476 = vsyncadd [#allocation10], 4294966784  ;;  %v110_v0 = vld [vmem:[#allocation9] sm:$0xff]  ;;  %v111_v1 = vld [vmem:[#allocation9 + $0x8] sm:$0xff]  ;;  %s484_s2 = smov [#allocation12]   ;;  %s331_s30 = sshll.u32 %s532_s3, 4  ;;  %s332_s30 = int_to_ptr.hbm [resolvable:$true] %s331_s30 }
   0xf   :  { %v112_v2 = vld [vmem:[#allocation11] sm:$0xff]  ;;  %v113_v3 = vld [vmem:[#allocation11 + $0x8] sm:$0xff]  ;;  %v351_v4 = vclamps-f32 %v110_v0, 10.0  ;;  %v352_v8 = vclamps-f32 %v111_v1, 10.0  ;;  %s329_s27 = sshll.u32 %s484_s2, 4  ;;  %s330_s27 = int_to_ptr.vmem [resolvable:$true] %s329_s27 }
  0x10   :  { %v108_v5 = vld [vmem:[#allocation6] sm:$0xff]  ;;  %v118_v6 = vmax.f32 %v112_v2, -10.0  ;;  %v119_v7 = vmax.f32 %v113_v3, -10.0  ;;  %v109_v10 = vld [vmem:[#allocation6 + $0x8] sm:$0xff] }
  0x11   :  { %v176_v9 = vsub.f32 %v351_v4, %v108_v5  ;;  %v177_v13 = vsub.f32 %v352_v8, %v109_v10  ;;  %v156_v18 = vmul.f32 100.0, %v108_v5  ;;  %vm154_vm0 = vcmp.le.f32.partialorder %v108_v5, %v351_v4 }
  0x12   :  { %v120_v11 = vmin.f32 %v118_v6, -1e-06  ;;  %v121_v12 = vmin.f32 %v119_v7, -1e-06  ;;  %v157_v21 = vmul.f32 100.0, %v109_v10  ;;  %vm155_vm1 = vcmp.le.f32.partialorder %v109_v10, %v352_v8 }
  0x13   :  { %v189_v16 = vmul.f32 %v176_v9, %v176_v9  ;;  %v190_v17 = vmul.f32 %v177_v13, %v177_v13  ;;  %v195_v19 = vand.u32 2147483647, %v176_v9  ;;  %v196_v20 = vand.u32 2147483647, %v177_v13 }
  0x14   :  { %v353_v14 = vadd.f32 -1e-06, %v120_v11  ;;  %v354_v15 = vadd.f32 -1e-06, %v121_v12  ;;  %v158_v25 = vsel %vm154_vm0, %v156_v18, 0.0  ;;  %v159_v27 = vsel %vm155_vm1, %v157_v21, 0.0 }
  0x15   :  { %v191_v24 = vadd.f32 %v190_v17, %v189_v16  ;;  %v197_v26 = vadd.f32 %v196_v20, %v195_v19  ;;  %v160_v31 = vsub.f32 %v351_v4, %v158_v25  ;;  %v161_v34 = vsub.f32 %v352_v8, %v159_v27 }
  0x16   :  { %369 = vrcp.f32 %v353_v14  ;;  %v166_v22 = vsub.f32 0.0, %v353_v14  ;;  %v167_v23 = vsub.f32 0.0, %v354_v15  ;;  %vm129_vm2 = vweird.f32 %v353_v14 }
  0x17   :  { %371 = vrcp.f32 %v354_v15  ;;  %321 = vst [vmem:[#allocation12 + $0x10] sm:$0xff] %v191_v24  ;;  %v135_v32 = vand.u32 2147483648, %v353_v14  ;;  %v133_v36 = vand.u32 2147483647, %v353_v14  ;;  %v150_v37 = vand.u32 2147483648, %v354_v15 }
  0x18   :  { %373 = vlog2.f32 %v166_v22  ;;  %324 = vst [vmem:[#allocation12 + $0x18] sm:$0xff] %v197_v26  ;;  %vm144_vm4 = vweird.f32 %v354_v15  ;;  %v148_v39 = vand.u32 2147483647, %v354_v15  ;;  %v162_v47 = vadd.f32 %v160_v31, %v120_v11 }
  0x19   :  { %375 = vlog2.f32 %v167_v23  ;;  %v136_v42 = vor.u32 1.1754944e-38, %v135_v32  ;;  %vm134_vm7 = vcmp.eq.f32.partialorder %v133_v36, 8.507059e+37  ;;  %v151_v46 = vor.u32 1.1754944e-38, %v150_v37 }
  0x1a   :  { %vm149_vm9 = vcmp.eq.f32.partialorder %v148_v39, 8.507059e+37  ;;  %v163_v49 = vadd.f32 %v161_v34, %v121_v12 }
  0x1c   :  { %v370_v28 = vpop.eup %369 }
  0x1d   :  { %v372_v29 = vpop.eup %371  ;;  %v125_v30 = vmul.f32 %v370_v28, %v353_v14  ;;  %vm130_vm3 = vweird.f32 %v370_v28 }
  0x1e   :  { %v140_v33 = vmul.f32 %v372_v29, %v354_v15  ;;  %vm145_vm5 = vweird.f32 %v372_v29  ;;  %v374_v41 = vpop.eup %373  ;;  %vm131_vm6 = vmor %vm129_vm2, %vm130_vm3 }
  0x1f   :  { %v126_v35 = vsub.f32 1.0, %v125_v30  ;;  %v376_v44 = vpop.eup %375  ;;  %vm146_vm8 = vmor %vm144_vm4, %vm145_vm5  ;;  %v169_v51 = vmul.f32 0.6931472, %v374_v41 }
  0x20   :  { %v141_v38 = vsub.f32 1.0, %v140_v33  ;;  %v171_v54 = vmul.f32 0.6931472, %v376_v44 }
  0x21   :  { %v127_v40 = vmul.f32 %v370_v28, %v126_v35 }
  0x22   :  { %v142_v43 = vmul.f32 %v372_v29, %v141_v38 }
  0x23   :  { %v128_v45 = vadd.f32 %v370_v28, %v127_v40 }
  0x24   :  { %v143_v48 = vadd.f32 %v372_v29, %v142_v43 }
  0x25   :  { %v132_v50 = vsel %vm131_vm6, %v370_v28, %v128_v45 }
  0x26   :  { %v137_v52 = vsel %vm134_vm7, %v136_v42, %v132_v50  ;;  %v147_v53 = vsel %vm146_vm8, %v372_v29, %v143_v48 }
  0x27   :  { %v152_v55 = vsel %vm149_vm9, %v151_v46, %v147_v53  ;;  %v164_v56 = vmul.f32 %v162_v47, %v137_v52 }
  0x28   :  { %v165_v57 = vmul.f32 %v163_v49, %v152_v55 }
  0x29   :  { %v172_v58 = vadd.f32 %v169_v51, %v164_v56 }
  0x2a   :  { %v173_v59 = vadd.f32 %v171_v54, %v165_v57 }
  0x2b   :  { %v355_v60 = vadd.f32 -1.0, %v172_v58 }
  0x2c   :  { %v356_v61 = vadd.f32 -1.0, %v173_v59 }
  0x2d   :  { %v183_v62 = vand.u32 2147483647, %v355_v60 }
  0x2e   :  { %v179_v63 = vadd.f32 %v356_v61, %v355_v60  ;;  %v184_v0 = vand.u32 2147483647, %v356_v61 }
  0x30   :  { %315 = vst [vmem:[#allocation12] sm:$0xff] %v179_v63  ;;  %v185_v1 = vadd.f32 %v184_v0, %v183_v62 }
  0x32   :  { %318 = vst [vmem:[#allocation12 + $0x8] sm:$0xff] %v185_v1 }
  0x33   :  { %337 = dma.vmem_to_hbm [thread:$0]  %s330_s27, 512, %s332_s30, [#allocation8], %s480_s20, %s480_s20, %s481_s21  }
  0x34   :  { %477 = dma.done.wait [#allocation8], 512  }
  0x35   :  { %478 = vsyncadd [#allocation8], 4294966784 }
  0x36   :  { %342 = vsyncpa [#allocation7], 1 }
  0x37   :  { %343 = vsyncpa [#allocation10], 1 }
  0x38   :  { %344 = vsyncpa [#allocation8], 1 }

</bundles_post_ra>
